<compile_context>
chip_gen: v7x
topology: tpu7x:2x2x1
jax: 0.10.0
libtpu: 0.0.40
codegen_flags: <defaults>
</compile_context>

<pallas_src>
import functools
from types import SimpleNamespace

import numpy as np
import jax
import jax.numpy as jnp
from jax.experimental import pallas as pl
from jax.experimental.pallas import tpu as pltpu


def _round_up(x, m):
    return ((x + m - 1) // m) * m


def _vmem_budget_bytes():
    """Generation-aware VMEM budget: <= 3/4 of physical VMEM and <= 48 MiB."""
    try:
        cap = int(pltpu.get_tpu_info().vmem_capacity_bytes)
    except Exception:
        cap = 64 * 1024 * 1024          # v7x per-TensorCore worst case
    return int(min(cap * 3 // 4, 48 * 1024 * 1024))


# ------------------------------ Pallas kernels ------------------------------ #

def _pool_kernel(x_ref, o_ref, *, pos_pool, neg_pool, use_exp, k_rows, bn):
    """Pool one row tile of (N, T, 2C) over T.

    Rows < K use pos_pool, rows >= K (the mixed samples) use neg_pool; optional
    exp.  Out-of-bounds rows of a ragged tail tile are dropped by Pallas on the
    store, so exp(garbage) never reaches the output.
    """
    x = x_ref[...].astype(jnp.float32)                     # (bn, T, 2C)

    def _pool(mode):
        return jnp.max(x, axis=1) if mode == "max" else jnp.mean(x, axis=1)

    p = _pool(pos_pool)
    if neg_pool != pos_pool:
        rows = pl.program_id(0) * bn + jax.lax.broadcasted_iota(
            jnp.int32, (bn, 1), 0)
        p = jnp.where(rows < k_rows, p, _pool(neg_pool))
    if use_exp:
        p = jnp.exp(p)
    o_ref[...] = p


def _loss_kernel(aidx_ref, vidx_ref, cond_ref, tgt_ref, pfirst_ref, pmix_ref,
                 out_ref, *, bk, cp):
    """One row-tile of one-hot scatter + target-filtered -log(pos/(pos+neg))."""
    i = pl.program_id(0)
    rows = i * bk + jax.lax.broadcasted_iota(jnp.int32, (bk, 1), 0)   # (bk, 1)
    aidx = aidx_ref[...]                                              # (1, Mp) i32
    vidx = vidx_ref[...]                                              # (1, Mp) i32
    cond = cond_ref[...]                                              # (1, Mp) f32

    # One-hot "scatter" matrices gated by the disjoint-label condition (exact 0/1).
    sa = jnp.where(rows == aidx, 1.0, 0.0) * cond                     # (bk, Mp)
    sv = jnp.where(rows == vidx, 1.0, 0.0) * cond

    pmix = pmix_ref[...]                                              # (Mp, 2cp)
    mix_v = pmix[:, :cp]      # channel 0 -> vision negatives
    mix_a = pmix[:, cp:]      # channel 1 -> audio  negatives

    nt = (((1,), (0,)), ((), ()))
    # f32 matmuls: exp'ed pooled values would not survive bf16 at 1e-4 tolerance.
    a_neg = jax.lax.dot_general(sa, mix_a, dimension_numbers=nt,
                                preferred_element_type=jnp.float32)   # (bk, cp)
    v_neg = jax.lax.dot_general(sv, mix_v, dimension_numbers=nt,
                                preferred_element_type=jnp.float32)

    a_set = (jnp.sum(sa, axis=1, keepdims=True) > 0.0).astype(jnp.float32)  # (bk,1)
    v_set = (jnp.sum(sv, axis=1, keepdims=True) > 0.0).astype(jnp.float32)

    pfirst = pfirst_ref[...]                                          # (bk, 2cp)
    a_pos = a_set * pfirst[:, :cp]    # channel 0 -> audio  positives (assignment)
    v_pos = v_set * pfirst[:, cp:]    # channel 1 -> vision positives

    tgt = tgt_ref[...]                                                # (bk, cp)
    a_pos_f = a_pos * tgt
    v_pos_f = v_pos * tgt
    a_neg_f = a_neg * tgt
    v_neg_f = v_neg * tgt

    # pos!=0 iff neg!=0 for target-selected entries (probs / exp are > 0), so a
    # single pos-derived mask reproduces the reference's independent filters.
    mask_a = a_pos_f != 0.0
    mask_v = v_pos_f != 0.0
    ma = mask_a.astype(jnp.float32)
    mv = mask_v.astype(jnp.float32)

    num_a = jnp.where(mask_a, a_pos_f, 1.0)
    den_a = jnp.where(mask_a, a_pos_f + a_neg_f, 1.0)
    num_v = jnp.where(mask_v, v_pos_f, 1.0)
    den_v = jnp.where(mask_v, v_pos_f + v_neg_f, 1.0)
    # TODO(synk): num * pl.reciprocal(den, approx=True) would offload the divide
    #             to the EUP, but its relative error is marginal vs the 1e-4 tol.
    term_a = -jnp.log(num_a / den_a) * ma
    term_v = -jnp.log(num_v / den_v) * mv

    # Per-tile partial sums into this tile's own output block -> the grid can be
    # "parallel" (both v7x TensorCores); final tiny reduce happens in the wrapper.
    tv = jnp.sum(term_v, axis=0, keepdims=True)    # (1, cp) vision sum
    cv = jnp.sum(mv, axis=0, keepdims=True)        # (1, cp) vision count
    ta = jnp.sum(term_a, axis=0, keepdims=True)    # (1, cp) audio  sum
    ca = jnp.sum(ma, axis=0, keepdims=True)        # (1, cp) audio  count
    sub = jax.lax.broadcasted_iota(jnp.int32, (4, cp), 0)
    part = (jnp.where(sub == 0, tv, 0.0) + jnp.where(sub == 1, cv, 0.0)
            + jnp.where(sub == 2, ta, 0.0) + jnp.where(sub == 3, ca, 0.0))
    out_ref[...] = part.reshape(1, 4, cp)


# ------------------------------ kernel wrappers ------------------------------ #

def _pool_all(x, k_rows, pos_pool, neg_pool, use_exp, vmem_budget):
    """x: (N, T, L) native layout -> pooled (N, L).  Single pass, no padded copy."""
    N, T, L = x.shape
    t_pad = _round_up(T, 8)
    l_pad = _round_up(L, 128)
    per_row = (t_pad + 1) * l_pad * 4                      # f32 input + output row
    bn = max(8, (vmem_budget // (2 * per_row) // 8) * 8)   # 2x: double buffering
    bn = min(bn, 1024)
    if N <= bn:
        bn = N                                             # single full-extent tile
    kern = functools.partial(_pool_kernel, pos_pool=pos_pool, neg_pool=neg_pool,
                             use_exp=use_exp, k_rows=k_rows, bn=bn)
    return pl.pallas_call(
        kern,
        out_shape=jax.ShapeDtypeStruct((N, L), jnp.float32),
        grid=(pl.cdiv(N, bn),),
        in_specs=[pl.BlockSpec((bn, T, L), lambda i: (i, 0, 0))],
        out_specs=pl.BlockSpec((bn, L), lambda i: (i, 0)),
        compiler_params=pltpu.CompilerParams(
            dimension_semantics=("parallel",),
            vmem_limit_bytes=vmem_budget),
    )(x)


class YBLoss:
    """Contrastive loss (YBLoss).  margin / tau kept for parity, unused in forward."""

    def __init__(self, margin=1.0, tau=0.05):
        self.margin = margin
        self.tau = tau

    def __call__(self, all_prob, audio_idx, vis_idx, target, opt):
        if opt.pos_pool not in ("max", "mean") or opt.neg_pool not in ("max", "mean"):
            # TODO(synk): other pool modes leave pos/neg all-zero in the reference
            # (NaN means); not reproduced.
            raise NotImplementedError((opt.pos_pool, opt.neg_pool))

        all_prob = jnp.asarray(all_prob, jnp.float32)
        target = jnp.asarray(target, jnp.float32)
        audio_idx = jnp.asarray(audio_idx, jnp.int32)
        vis_idx = jnp.asarray(vis_idx, jnp.int32)

        N, T, _, C = all_prob.shape
        M = audio_idx.shape[0]
        K = N - M
        budget = _vmem_budget_bytes()

        Cp = _round_up(max(C, 1), 128)      # lane-dense class axis
        # 256-deep contraction for the v6e/v7x MXU when M is large; extra zero
        # padding is negligible on v5e (128x128 MXU).
        Mp = _round_up(M, 256) if M > 128 else _round_up(max(M, 1), 128)

        # --- stage 1: pool over T on the native (N, T, 2*C) layout (free reshape).
        pooled = _pool_all(all_prob.reshape(N, T, 2 * C), K,
                           opt.pos_pool, opt.neg_pool, bool(opt.exp), budget)

        # --- row-tile size for the loss kernel (single tile whenever it fits). ---
        stream_row_bytes = 2 * (2 * Cp + Cp) * 4     # dbuf'd pooled-first + target
        resident_bytes = (Mp * 2 * Cp + 3 * Mp) * 4  # Buffered(1) pooled-mix + idx
        if K <= 256:
            bk = _round_up(max(K, 1), 8)             # grid == 1: no serial grid loop
        else:
            bk_cap = max(8, ((budget // 2 - resident_bytes)
                             // stream_row_bytes // 8) * 8)
            bk = max(8, min(1024, bk_cap))
        Kp = _round_up(max(K, 1), bk)
        grid = Kp // bk

        # --- tiny pooled intermediates: pad only these to lane-dense shapes. ---
        pf = pooled[:K].reshape(K, 2, C)
        pm = pooled[N - M:].reshape(M, 2, C)
        pfirst_p = jnp.zeros((Kp, 2, Cp), jnp.float32).at[:K, :, :C].set(pf)
        pfirst_p = pfirst_p.reshape(Kp, 2 * Cp)
        pmix_p = jnp.zeros((Mp, 2, Cp), jnp.float32).at[:M, :, :C].set(pm)
        pmix_p = pmix_p.reshape(Mp, 2 * Cp)
        tgt_p = jnp.zeros((Kp, Cp), jnp.float32).at[:K, :C].set(target)

        # Pair condition: paired audio / vision label sets are disjoint.
        overlap = jnp.sum(target[audio_idx] * target[vis_idx], axis=-1)
        cond_p = jnp.zeros((1, Mp), jnp.float32).at[0, :M].set(
            (overlap == 0.0).astype(jnp.float32))
        aidx_p = jnp.full((1, Mp), -1, jnp.int32).at[0, :M].set(audio_idx)
        vidx_p = jnp.full((1, Mp), -1, jnp.int32).at[0, :M].set(vis_idx)

        const = pl.Buffered(1)   # resident / constant blocks: no double-buffer copy
        kern = functools.partial(_loss_kernel, bk=bk, cp=Cp)
        parts = pl.pallas_call(
            kern,
            out_shape=jax.ShapeDtypeStruct((grid, 4, Cp), jnp.float32),
            grid=(grid,),
            in_specs=[
                pl.BlockSpec((1, Mp), lambda i: (0, 0), pipeline_mode=const),
                pl.BlockSpec((1, Mp), lambda i: (0, 0), pipeline_mode=const),
                pl.BlockSpec((1, Mp), lambda i: (0, 0), pipeline_mode=const),
                pl.BlockSpec((bk, Cp), lambda i: (i, 0)),        # target row tile
                pl.BlockSpec((bk, 2 * Cp), lambda i: (i, 0)),    # pooled first-K tile
                pl.BlockSpec((Mp, 2 * Cp), lambda i: (0, 0),     # pooled mixed
                             pipeline_mode=const),
            ],
            out_specs=pl.BlockSpec((1, 4, Cp), lambda i: (i, 0, 0)),
            compiler_params=pltpu.CompilerParams(
                dimension_semantics=("parallel",),
                vmem_limit_bytes=budget),
        )(aidx_p, vidx_p, cond_p, tgt_p, pfirst_p, pmix_p)

        acc = jnp.sum(parts, axis=(0, 2))   # (v_sum, v_cnt, a_sum, a_cnt)
        # NOTE: if no pair passes the disjointness test both counts are 0 and the
        # result is NaN, matching the reference's mean over an empty selection.
        return acc[0] / acc[1] + acc[2] / acc[3]


# ------------------------------ numpy reference ------------------------------ #

def _reference(all_prob, audio_idx, vis_idx, target, opt):
    ap = np.asarray(all_prob, dtype=np.float64)
    tg = np.asarray(target, dtype=np.float64)
    a_idx = np.asarray(audio_idx)
    v_idx = np.asarray(vis_idx)
    N = ap.shape[0]
    M = len(a_idx)
    K = N - M
    C = ap.shape[-1]
    v_pos = np.zeros((K, C)); v_neg = np.zeros((K, C))
    a_pos = np.zeros((K, C)); a_neg = np.zeros((K, C))
    for i in range(M):
        if (tg[a_idx[i]] * tg[v_idx[i]]).sum() == 0:
            if opt.pos_pool == "max":
                pa = ap[a_idx[i], :, 0, :].max(0)
                pv = ap[v_idx[i], :, 1, :].max(0)
            else:
                pa = ap[a_idx[i], :, 0, :].mean(0)
                pv = ap[v_idx[i], :, 1, :].mean(0)
            pm = ap[N - M + i].max(0) if opt.neg_pool == "max" else ap[N - M + i].mean(0)
            if opt.exp:
                pa, pv, pm = np.exp(pa), np.exp(pv), np.exp(pm)
            a_pos[a_idx[i]] = pa
            v_pos[v_idx[i]] = pv
            a_neg[a_idx[i]] += pm[1]
            v_neg[v_idx[i]] += pm[0]
    v_pos_f = v_pos * tg; v_neg_f = v_neg * tg
    a_pos_f = a_pos * tg; a_neg_f = a_neg * tg
    vp = v_pos_f[v_pos_f != 0]; vn = v_neg_f[v_neg_f != 0]
    aP = a_pos_f[a_pos_f != 0]; aN = a_neg_f[a_neg_f != 0]
    return float((-np.log(vp / (vp + vn))).mean() + (-np.log(aP / (aP + aN))).mean())


# ----------------------------------- main ----------------------------------- #

if __name__ == "__main__":
    key = jax.random.PRNGKey(0)
    K, M, T, C = 6, 6, 10, 25
    N = K + M

    all_prob = jax.nn.sigmoid(jax.random.normal(key, (N, T, 2, C), jnp.float32))

    # Deterministic multi-hot targets: one distinct class per sample, plus a
    # shared class for samples 0 and 1 (so one pair fails the disjointness test).
    target = jnp.zeros((K, C), jnp.float32)
    target = target.at[jnp.arange(K), jnp.arange(K)].set(1.0)
    target = target.at[0, 10].set(1.0).at[1, 10].set(1.0)

    audio_idx = jnp.arange(K, dtype=jnp.int32)
    vis_idx = jnp.roll(jnp.arange(K, dtype=jnp.int32), -1)

    loss_mod = YBLoss(margin=1.0, tau=0.05)

    configs = [
        SimpleNamespace(exp=True, pos_pool="max", neg_pool="mean"),
        SimpleNamespace(exp=True, pos_pool="mean", neg_pool="max"),
        SimpleNamespace(exp=False, pos_pool="max", neg_pool="max"),
    ]
    for opt in configs:
        out = loss_mod(all_prob, audio_idx, vis_idx, target, opt)
        jax.block_until_ready(out)
        got = float(out)
        ref = _reference(all_prob, audio_idx, vis_idx, target, opt)
        assert np.isfinite(got), (opt, got)
        assert abs(got - ref) <= 1e-4 * max(1.0, abs(ref)), (opt, got, ref)

    print("KERNEL_OK")
</pallas_src>

<mosaic_0001>
module attributes {stable_mosaic.version = 11 : i64} {
  func.func @_pool_kernel(%arg0: i32, %arg1: memref<12x10x50xf32, #tpu.memory_space<vmem>>, %arg2: memref<12x50xf32, #tpu.memory_space<vmem>>) attributes {dimension_semantics = [#tpu.dimension_semantics<parallel>], iteration_bounds = array<i64: 1>, scalar_prefetch = 0 : i64, scratch_operands = 0 : i64, tpu.core_type = #tpu.core_type<tc>, window_params = [{transform_indices = @transform_0, window_bounds = array<i64: 12, 10, 50>}, {transform_indices = @transform_1, window_bounds = array<i64: 12, 50>}]} {
    %c0 = arith.constant 0 : index
    %c0_0 = arith.constant 0 : index
    %c0_1 = arith.constant 0 : index
    %0 = vector.load %arg1[%c0, %c0_0, %c0_1] : memref<12x10x50xf32, #tpu.memory_space<vmem>>, vector<12x10x50xf32>
    %cst = arith.constant dense<0xFF800000> : vector<12x50xf32>
    %1 = vector.multi_reduction <maximumf>, %0, %cst [1] : vector<12x10x50xf32> to vector<12x50xf32>
    %c12_i32 = arith.constant 12 : i32
    %2 = arith.muli %arg0, %c12_i32 : i32
    %3 = tpu.iota {dimensions = array<i32: 0>} : vector<12x1xi32>
    %4 = vector.broadcast %2 : i32 to vector<12x1xi32>
    %5 = arith.addi %4, %3 : vector<12x1xi32>
    %c6_i32 = arith.constant 6 : i32
    %6 = vector.broadcast %c6_i32 : i32 to vector<12x1xi32>
    %7 = arith.cmpi slt, %5, %6 : vector<12x1xi32>
    %cst_2 = arith.constant dense<0.000000e+00> : vector<12x50xf32>
    %8 = vector.multi_reduction <add>, %0, %cst_2 [1] : vector<12x10x50xf32> to vector<12x50xf32>
    %cst_3 = arith.constant 1.000000e+01 : f32
    %9 = vector.broadcast %cst_3 : f32 to vector<12x50xf32>
    %10 = arith.divf %8, %9 : vector<12x50xf32>
    %11 = vector.shape_cast %7 : vector<12x1xi1> to vector<12x1xi1>
    %12 = vector.broadcast %11 : vector<12x1xi1> to vector<12x50xi1>
    %13 = arith.select %12, %1, %10 : vector<12x50xi1>, vector<12x50xf32>
    %14 = math.exp %13 : vector<12x50xf32>
    %c0_4 = arith.constant 0 : index
    %c0_5 = arith.constant 0 : index
    %15 = vector.load %arg2[%c0_4, %c0_5] : memref<12x50xf32, #tpu.memory_space<vmem>>, vector<12x50xf32>
    tpu.vector_store %arg2[%c0_4, %c0_5], %14 {strides = array<i32>} : memref<12x50xf32, #tpu.memory_space<vmem>>, vector<12x50xf32>,
    return
  }
  func.func @transform_0(%arg0: i32) -> (i32, i32, i32) {
    %c0_i32 = arith.constant 0 : i32
    %c0_i32_0 = arith.constant 0 : i32
    %c0_i32_1 = arith.constant 0 : i32
    return %arg0, %c0_i32, %c0_i32_0 : i32, i32, i32
  }
  func.func @transform_1(%arg0: i32) -> (i32, i32) {
    %c0_i32 = arith.constant 0 : i32
    %c0_i32_0 = arith.constant 0 : i32
    return %arg0, %c0_i32 : i32, i32
  }
}

</mosaic_0001>

<bundles_post_ra>
// kernel: tpu_custom_call.1
= control target key start
LH: loop header
LB: loop body
LE: loop exit
PB: predicated region body
PF: predicated region fallthrough
CT: control target
= control target key end

     0   :  { %6 = vsyncpa [#allocation3], 0  ;;  %vm33_vm0 = vcmask 408576   ;;  %vm35_vm1 = vcmask 402432   ;;  %v144_v51 = vlaneseq  ;;  %vm289_vm2 = vcmask 1041409   ;;  %s632_s0 = inlined_call_operand.vmem [shape: f32[12,10,50], index: 0, kind: input, shape index: {}]   ;;  %s633_s1 = inlined_call_operand.hbm [shape: f32[12,50], index: 1, kind: output, shape index: {}]  }
   0x1   :  { %v404_v0 = vld [vmem:[%s632_s0] sm:$0xff]  ;;  %v409_v1 = vld [vmem:[%s632_s0 + $0x8] sm:$0x3]  ;;  %v416_v3 = vld [vmem:[%s632_s0 + $0x10] sm:$0xff]  ;;  %vm291_vm3 = vcmask 1042434   ;;  %vm293_vm4 = vcmask 1043459  }
   0x2   :  { %v34_v2 = vsel %vm33_vm0, %v404_v0, -inf  ;;  %v421_v4 = vld [vmem:[%s632_s0 + $0x18] sm:$0x3]  ;;  %v36_v5 = vsel %vm35_vm1, %v409_v1, -inf  ;;  %v428_v6 = vld [vmem:[%s632_s0 + $0x20] sm:$0xff]  ;;  %v44_v8 = vsel %vm33_vm0, %v416_v3, -inf }
   0x3   :  { %v37_v7 = vmax.f32 %v34_v2, %v36_v5  ;;  %v45_v9 = vsel %vm35_vm1, %v421_v4, -inf  ;;  %v437_v10 = vld [vmem:[%s632_s0 + $0x28] sm:$0x3]  ;;  %v53_v12 = vsel %vm33_vm0, %v428_v6, -inf  ;;  %v446_v15 = vld [vmem:[%s632_s0 + $0x30] sm:$0xff]  ;;  %v456_v19 = vld [vmem:[%s632_s0 + $0x40] sm:$0xff] }
   0x4   :  { %v46_v11 = vmax.f32 %v44_v8, %v45_v9  ;;  %v54_v14 = vsel %vm35_vm1, %v437_v10, -inf  ;;  %v451_v16 = vld [vmem:[%s632_s0 + $0x38] sm:$0x3]  ;;  %v461_v20 = vld [vmem:[%s632_s0 + $0x48] sm:$0x3]  ;;  %v62_v22 = vsel %vm33_vm0, %v446_v15, -inf }
   0x5   :  { %v38_v13 = vrot.slane %v37_v7, 4  ;;  %v55_v18 = vmax.f32 %v53_v12, %v54_v14  ;;  %v63_v23 = vsel %vm35_vm1, %v451_v16, -inf  ;;  %v470_v24 = vld [vmem:[%s632_s0 + $0x50] sm:$0xff]  ;;  %v475_v25 = vld [vmem:[%s632_s0 + $0x58] sm:$0x3]  ;;  %v71_v29 = vsel %vm33_vm0, %v456_v19, -inf }
   0x6   :  { %v47_v17 = vrot.slane %v46_v11, 4  ;;  %v64_v28 = vmax.f32 %v62_v22, %v63_v23  ;;  %v72_v31 = vsel %vm35_vm1, %v461_v20, -inf  ;;  %v80_v32 = vsel %vm33_vm0, %v470_v24, -inf  ;;  %v488_v34 = vld [vmem:[%s632_s0 + $0x60] sm:$0xff]  ;;  %v493_v35 = vld [vmem:[%s632_s0 + $0x68] sm:$0x3] }
   0x7   :  { %v39_v21 = vmax.f32 %v37_v7, %v38_v13  ;;  %v56_v27 = vrot.slane %v55_v18, 4  ;;  %v81_v33 = vsel %vm35_vm1, %v475_v25, -inf  ;;  %v73_v39 = vmax.f32 %v71_v29, %v72_v31  ;;  %v502_v48 = vld [vmem:[%s632_s0 + $0x70] sm:$0xff]  ;;  %v507_v52 = vld [vmem:[%s632_s0 + $0x78] sm:$0x3] }
   0x8   :  { %v48_v26 = vmax.f32 %v46_v11, %v47_v17  ;;  %v65_v38 = vrot.slane %v64_v28, 4  ;;  %v82_v41 = vmax.f32 %v80_v32, %v81_v33  ;;  %v89_v42 = vsel %vm33_vm0, %v488_v34, -inf }
   0x9   :  { %v40_v30 = vrot.slane %v39_v21, 2  ;;  %v57_v37 = vmax.f32 %v55_v18, %v56_v27  ;;  %v90_v43 = vsel %vm35_vm1, %v493_v35, -inf  ;;  %v74_v47 = vrot.slane %v73_v39, 4 }
   0xa   :  { %v49_v36 = vrot.slane %v48_v26, 2  ;;  %v66_v46 = vmax.f32 %v64_v28, %v65_v38  ;;  %v83_v49 = vrot.slane %v82_v41, 4  ;;  %v91_v50 = vmax.f32 %v89_v42, %v90_v43 }
   0xb   :  { %v41_v40 = vmax.f32 %v39_v21, %v40_v30  ;;  %v58_v45 = vrot.slane %v57_v37, 2  ;;  %v75_v55 = vmax.f32 %v73_v39, %v74_v47  ;;  %v98_v56 = vsel %vm33_vm0, %v502_v48, -inf }
   0xc   :  { %v50_v44 = vmax.f32 %v48_v26, %v49_v36  ;;  %v67_v54 = vrot.slane %v66_v46, 2  ;;  %v84_v58 = vmax.f32 %v82_v41, %v83_v49  ;;  %v92_v59 = vrot.slane %v91_v50, 4 }
   0xd   :  { %v59_v53 = vmax.f32 %v57_v37, %v58_v45  ;;  %v42_v57 = vrot.slane %v41_v40, 1  ;;  %v99_v60 = vsel %vm35_vm1, %v507_v52, -inf  ;;  %v76_v2 = vrot.slane %v75_v55, 2 }
   0xe   :  { %v51_v61 = vrot.slane %v50_v44, 1  ;;  %v68_v63 = vmax.f32 %v66_v46, %v67_v54  ;;  %v85_v5 = vrot.slane %v84_v58, 2  ;;  %v93_v7 = vmax.f32 %v91_v50, %v92_v59 }
   0xf   :  { %v60_v62 = vrot.slane %v59_v53, 1  ;;  %v100_v8 = vmax.f32 %v98_v56, %v99_v60  ;;  %v77_v11 = vmax.f32 %v75_v55, %v76_v2  ;;  %v152_v12 = vsel %vm33_vm0, %v404_v0, 0.0 }
  0x10   :  { %v69_v9 = vrot.slane %v68_v63, 1  ;;  %v515_v13 = vmax.f32 %v41_v40, %v42_v57  ;;  %v86_v14 = vmax.f32 %v84_v58, %v85_v5  ;;  %v94_v17 = vrot.slane %v93_v7, 2 }
  0x11   :  { %v101_v18 = vrot.slane %v100_v8, 4  ;;  %v517_v21 = vmax.f32 %v50_v44, %v51_v61  ;;  %v519_v22 = vmax.f32 %v59_v53, %v60_v62  ;;  %v521_v23 = vshrl.u32 %v144_v51, 7 }
  0x12   :  { %v153_v26 = vsel %vm35_vm1, %v409_v1, 0.0  ;;  %v78_v27 = vrot.slane %v77_v11, 1  ;;  %v161_v0 = vsel %vm33_vm0, %v416_v3, 0.0  ;;  %v527_v30 = vmax.f32 %v68_v63, %v69_v9 }
  0x13   :  { %v102_v28 = vmax.f32 %v100_v8, %v101_v18  ;;  %v154_v29 = vadd.f32 %v153_v26, %v152_v12  ;;  %v162_v31 = vsel %vm35_vm1, %v421_v4, 0.0  ;;  %v170_v32 = vsel %vm33_vm0, %v428_v6, 0.0 }
  0x14   :  { %v171_v33 = vsel %vm35_vm1, %v437_v10, 0.0  ;;  %v87_v36 = vrot.slane %v86_v14, 1  ;;  %v95_v37 = vmax.f32 %v93_v7, %v94_v17  ;;  %v163_v39 = vadd.f32 %v162_v31, %v161_v0  ;;  %v26_v17 = vld [vmem:[%s632_s0 + $0x88] sm:$0x3] }
  0x15   :  { %v103_v1 = vrot.slane %v102_v28, 2  ;;  %v155_v38 = vrot.slane %v154_v29, 4  ;;  %v172_v40 = vadd.f32 %v171_v33, %v170_v32  ;;  %v179_v3 = vsel %vm33_vm0, %v446_v15, 0.0  ;;  %v28_v32 = vld [vmem:[%s632_s0 + $0x98] sm:$0x3] }
  0x16   :  { %v180_v41 = vsel %vm35_vm1, %v451_v16, 0.0  ;;  %v539_v42 = vmax.f32 %v77_v11, %v78_v27  ;;  %v164_v44 = vrot.slane %v163_v39, 4  ;;  %v188_v10 = vsel %vm33_vm0, %v456_v19, 0.0 }
  0x17   :  { %v104_v4 = vmax.f32 %v102_v28, %v103_v1  ;;  %v156_v43 = vadd.f32 %v155_v38, %v154_v29  ;;  %v181_v6 = vadd.f32 %v180_v41, %v179_v3  ;;  %v173_v45 = vrot.slane %v172_v40, 4  ;;  %v27_v28 = vld [vmem:[%s632_s0 + $0x90] sm:$0xff]  ;;  %v30_v38 = vld [vmem:[%s632_s0 + $0xa8] sm:$0x3] }
  0x18   :  { %v189_v46 = vsel %vm35_vm1, %v461_v20, 0.0  ;;  %v96_v47 = vrot.slane %v95_v37, 1  ;;  %v165_v51 = vadd.f32 %v164_v44, %v163_v39  ;;  %v197_v16 = vsel %vm33_vm0, %v470_v24, 0.0  ;;  %v25_v24 = vld [vmem:[%s632_s0 + $0x80] sm:$0xff]  ;;  %v31_v41 = vld [vmem:[%s632_s0 + $0xb0] sm:$0xff] }
  0x19   :  { %v157_v49 = vrot.slane %v156_v43, 2  ;;  %v182_v50 = vrot.slane %v181_v6, 4  ;;  %v190_v15 = vadd.f32 %v189_v46, %v188_v10  ;;  %v174_v53 = vadd.f32 %v173_v45, %v172_v40 }
  0x1a   :  { %v198_v54 = vsel %vm35_vm1, %v475_v25, 0.0  ;;  %v105_v55 = vrot.slane %v104_v4, 1  ;;  %v166_v19 = vrot.slane %v165_v51, 2  ;;  %v206_v20 = vsel %vm33_vm0, %v488_v34, 0.0 }
  0x1b   :  { %v158_v56 = vadd.f32 %v157_v49, %v156_v43  ;;  %v183_v57 = vadd.f32 %v182_v50, %v181_v6  ;;  %v191_v58 = vrot.slane %v190_v15, 4  ;;  %v175_v59 = vrot.slane %v174_v53, 2 }
  0x1c   :  { %v199_v60 = vadd.f32 %v198_v54, %v197_v16  ;;  %v207_v2 = vsel %vm35_vm1, %v493_v35, 0.0  ;;  %v167_v25 = vadd.f32 %v166_v19, %v165_v51  ;;  %v556_v9 = vmax.f32 %v86_v14, %v87_v36 }
  0x1d   :  { %v159_v61 = vrot.slane %v158_v56, 1  ;;  %v184_v62 = vrot.slane %v183_v57, 2  ;;  %v192_v63 = vadd.f32 %v191_v58, %v190_v15  ;;  %v176_v5 = vadd.f32 %v175_v59, %v174_v53 }
  0x1e   :  { %v200_v7 = vrot.slane %v199_v60, 4  ;;  %v208_v8 = vadd.f32 %v207_v2, %v206_v20  ;;  %v558_v11 = vmax.f32 %v95_v37, %v96_v47  ;;  %v168_v18 = vrot.slane %v167_v25, 1 }
  0x1f   :  { %v185_v12 = vadd.f32 %v184_v62, %v183_v57  ;;  %v193_v34 = vrot.slane %v192_v63, 2  ;;  %v215_v27 = vsel %vm33_vm0, %v502_v48, 0.0  ;;  %v568_v14 = vmax.f32 %v104_v4, %v105_v55  ;;  %v29_v48 = vld [vmem:[%s632_s0 + $0xa0] sm:$0xff]  ;;  %v32_v4 = vld [vmem:[%s632_s0 + $0xb8] sm:$0x3]  ;;  %s388_s0 = smov [#allocation2]  }
  0x20   :  { %v201_v35 = vadd.f32 %v200_v7, %v199_v60  ;;  %v209_v26 = vrot.slane %v208_v8, 4  ;;  %v216_v0 = vsel %vm35_vm1, %v507_v52, 0.0  ;;  %v224_v31 = vsel %vm33_vm0, %v25_v24, 0.0  ;;  %s346_s25 = sshll.u32 %s388_s0, 4  ;;  %s347_s25 = int_to_ptr.vmem [resolvable:$true] %s346_s25 }
  0x21   :  { %v194_v29 = vadd.f32 %v193_v34, %v192_v63  ;;  %v160_v33 = vadd.f32 %v159_v61, %v158_v56  ;;  %v177_v36 = vrot.slane %v176_v5, 1  ;;  %v169_v39 = vadd.f32 %v168_v18, %v167_v25  ;;  %s364_s26 = scalar_lea.vmem %s347_s25, 256  ;;  %p369_p1 = scmp.lt.s32.totalorder %s347_s25, %s347_s25 }
  0x22   :  { %v202_v37 = vrot.slane %v201_v35, 2  ;;  %v210_v1 = vadd.f32 %v209_v26, %v208_v8  ;;  %v186_v52 = vrot.slane %v185_v12, 1  ;;  %v217_v40 = vadd.f32 %v216_v0, %v215_v27  ;;  %p365_p0 = scmp.ne.s32.totalorder %s347_s25, %s364_s26  ;;  %p370_p2 = scmp.lt.s32.totalorder %s364_s26, %s364_s26 }
  0x23   :  { %v225_v3 = vsel %vm35_vm1, %v26_v17, 0.0  ;;  %v233_v45 = vsel %vm33_vm0, %v27_v28, 0.0  ;;  %v195_v10 = vrot.slane %v194_v29, 1  ;;  %v234_v47 = vsel %vm35_vm1, %v28_v32, 0.0 }
  0x24   :  { %v203_v43 = vadd.f32 %v202_v37, %v201_v35  ;;  %v211_v6 = vrot.slane %v210_v1, 2  ;;  %v226_v44 = vadd.f32 %v225_v3, %v224_v31  ;;  %v218_v46 = vrot.slane %v217_v40, 4  ;;  %p371_p3 = por %p370_p2, %p369_p1 }
  0x25   :  { %v242_v49 = vsel %vm33_vm0, %v29_v48, 0.0  ;;  %v235_v53 = vadd.f32 %v234_v47, %v233_v45  ;;  %v243_v54 = vsel %vm35_vm1, %v30_v38, 0.0  ;;  %v251_v55 = vsel %vm33_vm0, %v31_v41, 0.0 }
  0x26   :  { %v204_v50 = vrot.slane %v203_v43, 1  ;;  %v212_v15 = vadd.f32 %v211_v6, %v210_v1  ;;  %v227_v51 = vrot.slane %v226_v44, 4  ;;  %v219_v16 = vadd.f32 %v218_v46, %v217_v40  ;;  %p372_p4 = pnand %p371_p3, %p365_p0 }
  0x27   :  { %v252_v56 = vsel %vm35_vm1, %v32_v4, 0.0  ;;  %v178_v57 = vadd.f32 %v177_v36, %v176_v5  ;;  %v236_v59 = vrot.slane %v235_v53, 4  ;;  %v187_v60 = vadd.f32 %v186_v52, %v185_v12 }
  0x28   :  { %v213_v58 = vrot.slane %v212_v15, 1  ;;  %v228_v19 = vadd.f32 %v227_v51, %v226_v44  ;;  %v220_v20 = vrot.slane %v219_v16, 2  ;;  %v244_v61 = vadd.f32 %v243_v54, %v242_v49 }
  0x29   :  { %v253_v62 = vadd.f32 %v252_v56, %v251_v55  ;;  %v196_v63 = vadd.f32 %v195_v10, %v194_v29  ;;  %v205_v2 = vadd.f32 %v204_v50, %v203_v43  ;;  %v237_v25 = vadd.f32 %v236_v59, %v235_v53 }
  0x2a   :  { %v229_v24 = vrot.slane %v228_v19, 2  ;;  %v221_v7 = vadd.f32 %v220_v20, %v219_v16  ;;  %v245_v8 = vrot.slane %v244_v61, 4  ;;  %v261_v17 = vmul.f32 0.1, %v160_v33 }
  0x2b   :  { %v254_v34 = vrot.slane %v253_v62, 4  ;;  %v214_v18 = vadd.f32 %v213_v58, %v212_v15  ;;  %v238_v26 = vrot.slane %v237_v25, 2  ;;  %v262_v27 = vmul.f32 0.1, %v169_v39 }
  0x2c   :  { %v230_v35 = vadd.f32 %v229_v24, %v228_v19  ;;  %v222_v5 = vrot.slane %v221_v7, 1  ;;  %v246_v28 = vadd.f32 %v245_v8, %v244_v61  ;;  %v263_v31 = vmul.f32 0.1, %v178_v57 }
  0x2d   :  { %v255_v0 = vadd.f32 %v254_v34, %v253_v62  ;;  %v239_v32 = vadd.f32 %v238_v26, %v237_v25  ;;  %v264_v48 = vmul.f32 0.1, %v187_v60  ;;  %v265_v37 = vmul.f32 0.1, %v196_v63 }
  0x2e   :  { %v231_v12 = vrot.slane %v230_v35, 1  ;;  %v247_v29 = vrot.slane %v246_v28, 2  ;;  %v290_v1 = vsel %vm289_vm2, %v517_v21, %v515_v13  ;;  %v223_v39 = vadd.f32 %v222_v5, %v221_v7 }
  0x2f   :  { %v256_v36 = vrot.slane %v255_v0, 2  ;;  %v240_v38 = vrot.slane %v239_v32, 1  ;;  %v292_v3 = vsel %vm291_vm3, %v519_v22, %v290_v1  ;;  %vm295_vm5 = vcmask 1044484  }
  0x30   :  { %v232_v33 = vadd.f32 %v231_v12, %v230_v35  ;;  %v248_v52 = vadd.f32 %v247_v29, %v246_v28  ;;  %v294_v43 = vsel %vm293_vm4, %v527_v30, %v292_v3  ;;  %vm297_vm6 = vcmask 1045509  }
  0x31   :  { %v257_v40 = vadd.f32 %v256_v36, %v255_v0  ;;  %v241_v41 = vadd.f32 %v240_v38, %v239_v32  ;;  %v296_v13 = vsel %vm295_vm5, %v539_v42, %v294_v43  ;;  %v266_v21 = vmul.f32 0.1, %v205_v2 }
  0x32   :  { %v269_v4 = vmul.f32 0.1, %v232_v33  ;;  %v249_v6 = vrot.slane %v248_v52, 1  ;;  %v298_v10 = vsel %vm297_vm6, %v556_v9, %v296_v13  ;;  %vm299_vm7 = vcmask 1046534  }
  0x33   :  { %v258_v44 = vrot.slane %v257_v40, 1  ;;  %v270_v45 = vmul.f32 0.1, %v241_v41  ;;  %v267_v47 = vmul.f32 0.1, %v214_v18  ;;  %v320_v49 = vsel %vm289_vm2, %v262_v27, %v261_v17 }
  0x34   :  { %v250_v46 = vadd.f32 %v249_v6, %v248_v52  ;;  %v300_v30 = vsel %vm299_vm7, %v558_v11, %v298_v10  ;;  %vm301_vm8 = vcmask 1047559   ;;  %v321_v50 = vsel %vm291_vm3, %v263_v31, %v320_v49 }
  0x35   :  { %v259_v22 = vadd.f32 %v258_v44, %v257_v40  ;;  %v327_v42 = vsel %vm289_vm2, %v270_v45, %v269_v4  ;;  %v268_v15 = vmul.f32 0.1, %v223_v39  ;;  %v322_v16 = vsel %vm293_vm4, %v264_v48, %v321_v50 }
  0x36   :  { %v271_v51 = vmul.f32 0.1, %v250_v46  ;;  %v323_v9 = vsel %vm295_vm5, %v265_v37, %v322_v16  ;;  %vm150_vm9 = vcmp.lt.s32.totalorder %v521_v23, 6  ;;  %v302_v54 = vsel %vm301_vm8, %v568_v14, %v300_v30 }
  0x37   :  { %v272_v53 = vmul.f32 0.1, %v259_v22  ;;  %v324_v55 = vsel %vm297_vm6, %v266_v21, %v323_v9  ;;  %vm339_vm10 = vcmask 404480  }
  0x38   :  { %v328_v11 = vsel %vm291_vm3, %v271_v51, %v327_v42  ;;  %v325_v56 = vsel %vm299_vm7, %v267_v47, %v324_v55 }
  0x39   :  { %v329_v57 = vsel %vm293_vm4, %v272_v53, %v328_v11  ;;  %v326_v58 = vsel %vm301_vm8, %v268_v15, %v325_v56 }
  0x3a   :  { %v336_v19 = vmul.f32 1.442695, %v329_v57  ;;  %v332_v59 = vsel %vm150_vm9, %v302_v54, %v326_v58 }
  0x3b   :  { %v334_v60 = vmul.f32 1.442695, %v332_v59 }
  0x3c   :  { %360 = vpow2.f32 %v336_v19 }
  0x3d   :  { %362 = vpow2.f32 %v334_v60 }
  0x46   :  { %v361_v23 = vpop.eup %360 }
  0x47   :  { %340 = vst.msk [vmem:[#allocation2 + $0x8] sm:$0xf] %vm339_vm10, %v361_v23  ;;  %v363_v14 = vpop.eup %362 }
  0x48   :  { %338 = vst.msk [vmem:[#allocation2] sm:$0xff] %vm33_vm0, %v363_v14 }
  0x49   :  { %375 = shalt.err (!%p372_p4)
}
  0x4a   :  { %s376_s29 = scalar_lea.hbm %s633_s1, 256 }
  0x4b   :  { %p377_p5 = scmp.ne.s32.totalorder %s633_s1, %s376_s29  ;;  %p380_p6 = scmp.lt.u32.totalorder %s376_s29, %s633_s1 }
  0x4d   :  { %p382_p7 = pnand %p380_p6, %p377_p5 }
  0x4f   :  { %385 = shalt.err (!%p382_p7)
}
  0x50   :  { %s389_s5 = smov 128   ;;  %s390_s6 = smov 8  }
  0x51   :  { %352 = dma.vmem_to_hbm [thread:$0]  %s347_s25, 256, %s633_s1, [#allocation3], %s389_s5, %s389_s5, %s390_s6  }
  0x52   :  { %386 = dma.done.wait [#allocation3], 256  }
  0x53   :  { %387 = vsyncadd [#allocation3], 4294967040 }
  0x54   :  { %356 = vsyncpa [#allocation3], 1 }

</bundles_post_ra>
